<compile_context>
chip_gen: v7x
topology: tpu7x:2x2x1
jax: 0.10.0
libtpu: 0.0.40
codegen_flags: <defaults>
</compile_context>

<pallas_src>
import math

import jax
import jax.numpy as jnp
from jax import lax
from jax.experimental import pallas as pl
from jax.experimental.pallas import tpu as pltpu

# ---- model hyper-parameters (small, consistent with the module) ----
B = 2        # batch
T = 8        # sequence length (== block_size + num_props flag for the mask)
C = 32       # n_embd
H = 4        # n_head
HD = C // H  # head dim
G = B * H    # fused (batch, head) dimension for batched attention einsums
N = B * T    # flattened rows
LN_EPS = 1e-5


def _layernorm(z, g, b):
    # PyTorch LayerNorm: biased variance over the last dim, eps inside sqrt.
    mu = jnp.mean(z, axis=-1, keepdims=True)
    var = jnp.mean((z - mu) ** 2, axis=-1, keepdims=True)
    return (z - mu) * lax.rsqrt(var + LN_EPS) * g + b


def _gelu_exact(z):
    # torch.nn.GELU() default = exact erf formulation.
    return 0.5 * z * (1.0 + lax.erf(z / jnp.sqrt(jnp.float32(2.0))))


def block_kernel(x_ref, wslab_ref, w2_ref, vec_ref, out_ref, attn_ref):
    # Single invocation (no grid): all operands are full arrays in VMEM.
    x = x_ref[...]                       # (B, T, C)
    xf = x.reshape(N, C)                 # (16, 32) — leading-dim merge only

    # ---- static slices of the packed parameter slabs (cheap windows) ----
    # weight slab (C, 8C) = [ wqkv (C,3C) | wp (C,C) | w1 (C,4C) ]
    wqkv = wslab_ref[:, 0:3 * C]         # 1/sqrt(HD) pre-folded into q columns
    wp = wslab_ref[:, 3 * C:4 * C]
    w1 = wslab_ref[:, 4 * C:8 * C]
    # vector slab (4, 128):
    #   row 0: ln1_g | ln1_b | ln2_g | ln2_b     row 1: bp | b2 | 0 | 0
    #   row 2: bqkv (3C) | 0                     row 3: b1 (4C)
    ln1_g = vec_ref[0:1, 0:C]
    ln1_b = vec_ref[0:1, C:2 * C]
    ln2_g = vec_ref[0:1, 2 * C:3 * C]
    ln2_b = vec_ref[0:1, 3 * C:4 * C]
    bp = vec_ref[1:2, 0:C]
    b2 = vec_ref[1:2, C:2 * C]
    bqkv = vec_ref[2:3, 0:3 * C]
    b1 = vec_ref[3:4, 0:4 * C]

    # ---- LN1 + fused QKV projection ----
    h1 = _layernorm(xf, ln1_g, ln1_b)
    qkv = jnp.dot(h1, wqkv, preferred_element_type=jnp.float32) + bqkv   # (N, 3C)

    # (N, 3C) column blocks -> (B*H, T, HD), batch ordered (b, h) so the attn
    # weights reshape straight to (B, H, T, T) with no in-kernel relayout.
    def heads(col0):
        pieces = [qkv[:, col0 + hh * HD: col0 + (hh + 1) * HD].reshape(B, T, HD)
                  for hh in range(H)]
        return jnp.stack(pieces, axis=1).reshape(G, T, HD)   # (B,H,T,HD)->(G,T,HD)

    qh = heads(0)        # (G, T, HD)
    kh = heads(C)
    vh = heads(2 * C)

    # ---- head-batched causal attention: 1 score einsum, 1 softmax, 1 value einsum ----
    row = lax.broadcasted_iota(jnp.int32, (T, T), 0)
    col = lax.broadcasted_iota(jnp.int32, (T, T), 1)
    causal = row >= col                                          # (T, T), broadcast in where
    att = jnp.einsum('gtd,gsd->gts', qh, kh,
                     preferred_element_type=jnp.float32)         # (G, T, T)
    att = jnp.where(causal[None], att, jnp.float32(-1e30))       # finite fill, no full mask copy
    att = jnp.exp(att - jnp.max(att, axis=-1, keepdims=True))
    att = att * pl.reciprocal(jnp.sum(att, axis=-1, keepdims=True), approx=True)
    # TODO(synk): attn_drop / resid_drop / mlp Dropout are identity (eval mode); no RNG dropout.
    attn_ref[...] = att.reshape(B, H, T, T)                      # leading split only

    y = jnp.einsum('gts,gsd->gtd', att, vh,
                   preferred_element_type=jnp.float32)           # (G, T, HD)

    # ---- single output-projection matmul (replaces per-head accumulation) ----
    y4 = y.reshape(B, H, T, HD)
    yc = jnp.concatenate([y4[:, hh].reshape(N, HD) for hh in range(H)], axis=1)  # (N, C)
    proj = jnp.dot(yc, wp, preferred_element_type=jnp.float32)

    x1 = xf + proj + bp                                          # +residual (N, C)

    # ---- LN2 + MLP + residual ----
    h2 = _layernorm(x1, ln2_g, ln2_b)
    m = jnp.dot(h2, w1, preferred_element_type=jnp.float32) + b1
    m = _gelu_exact(m)
    m = jnp.dot(m, w2_ref[...], preferred_element_type=jnp.float32) + b2
    out_ref[...] = (x1 + m).reshape(B, T, C)


def prepare_params(p):
    """One-time parameter packing (hoisted out of the per-call forward).

    Returns the fused/packed arrays; cache and reuse them across forward calls
    so the QKV fuse / scale fold / concatenation is never re-done per step.
    """
    scale = jnp.float32(1.0 / math.sqrt(HD))
    wqkv = jnp.concatenate([p["wq"] * scale, p["wk"], p["wv"]], axis=1)      # (C, 3C)
    bqkv = jnp.concatenate([p["bq"] * scale, p["bk"], p["bv"]], axis=1)      # (1, 3C)
    wslab = jnp.concatenate([wqkv, p["wp"], p["w1"]], axis=1)                # (C, 8C) = (32, 256)

    vec = jnp.zeros((4, 4 * C), jnp.float32)                                 # (4, 128)
    vec = vec.at[0, 0:C].set(p["ln1_g"][0])
    vec = vec.at[0, C:2 * C].set(p["ln1_b"][0])
    vec = vec.at[0, 2 * C:3 * C].set(p["ln2_g"][0])
    vec = vec.at[0, 3 * C:4 * C].set(p["ln2_b"][0])
    vec = vec.at[1, 0:C].set(p["bp"][0])
    vec = vec.at[1, C:2 * C].set(p["b2"][0])
    vec = vec.at[2, 0:3 * C].set(bqkv[0])
    vec = vec.at[3, 0:4 * C].set(p["b1"][0])
    return {"wslab": wslab, "w2": p["w2"], "vec": vec}


@jax.jit
def block_forward(x, wslab, w2, vec):
    """x: (B, T, C) float32. Returns (out (B,T,C), attn (B,H,T,T))."""
    vmem = pl.BlockSpec(memory_space=pltpu.MemorySpace.VMEM)
    out, attn = pl.pallas_call(
        block_kernel,
        out_shape=(jax.ShapeDtypeStruct((B, T, C), jnp.float32),
                   jax.ShapeDtypeStruct((B, H, T, T), jnp.float32)),
        in_specs=[vmem, vmem, vmem, vmem],
        out_specs=(vmem, vmem),
    )(x, wslab, w2, vec)
    return out, attn


# ------------------------- pure-JAX reference -------------------------
def ref_block(x, p):
    h = _layernorm(x, p["ln1_g"], p["ln1_b"])
    q = h @ p["wq"] + p["bq"]
    k = h @ p["wk"] + p["bk"]
    v = h @ p["wv"] + p["bv"]
    qh = q.reshape(B, T, H, HD).transpose(0, 2, 1, 3)
    kh = k.reshape(B, T, H, HD).transpose(0, 2, 1, 3)
    vh = v.reshape(B, T, H, HD).transpose(0, 2, 1, 3)
    att = (qh @ kh.transpose(0, 1, 3, 2)) * (1.0 / math.sqrt(HD))
    mask = jnp.tril(jnp.ones((T, T), dtype=bool))
    att = jnp.where(mask[None, None], att, -jnp.inf)
    att = jax.nn.softmax(att, axis=-1)
    y = (att @ vh).transpose(0, 2, 1, 3).reshape(B, T, C)
    y = y @ p["wp"] + p["bp"]
    x1 = x + y
    h2 = _layernorm(x1, p["ln2_g"], p["ln2_b"])
    m = _gelu_exact(h2 @ p["w1"] + p["b1"]) @ p["w2"] + p["b2"]
    return x1 + m, att


def make_params(key):
    ks = jax.random.split(key, 12)
    s = 0.02
    p = {
        "ln1_g": jnp.ones((1, C), jnp.float32) + s * jax.random.normal(ks[0], (1, C)),
        "ln1_b": s * jax.random.normal(ks[1], (1, C)),
        "wq": s * jax.random.normal(ks[2], (C, C)),
        "bq": s * jax.random.normal(ks[3], (1, C)),
        "wk": s * jax.random.normal(ks[4], (C, C)),
        "bk": s * jax.random.normal(ks[5], (1, C)),
        "wv": s * jax.random.normal(ks[6], (C, C)),
        "bv": s * jax.random.normal(ks[7], (1, C)),
        "wp": s * jax.random.normal(ks[8], (C, C)),
        "bp": jnp.zeros((1, C), jnp.float32),
        "ln2_g": jnp.ones((1, C), jnp.float32),
        "ln2_b": jnp.zeros((1, C), jnp.float32),
        "w1": s * jax.random.normal(ks[9], (C, 4 * C)),
        "b1": jnp.zeros((1, 4 * C), jnp.float32),
        "w2": s * jax.random.normal(ks[10], (4 * C, C)),
        "b2": jnp.zeros((1, C), jnp.float32),
    }
    return {k: v.astype(jnp.float32) for k, v in p.items()}


if __name__ == "__main__":
    key = jax.random.PRNGKey(0)
    kx, kp = jax.random.split(key)
    x = jax.random.normal(kx, (B, T, C), dtype=jnp.float32)
    params = make_params(kp)

    # one-time weight fusion/packing (do NOT redo this per forward call)
    fused = prepare_params(params)

    out, attn = block_forward(x, fused["wslab"], fused["w2"], fused["vec"])
    out = jax.block_until_ready(out)
    attn = jax.block_until_ready(attn)

    ref_out, ref_attn = ref_block(x, params)
    assert out.shape == (B, T, C) and attn.shape == (B, H, T, T)
    assert bool(jnp.allclose(out, ref_out, rtol=1e-2, atol=1e-2))
    assert bool(jnp.allclose(attn, ref_attn, rtol=1e-2, atol=1e-2))
    print("KERNEL_OK")
</pallas_src>

<mosaic_0001>
module attributes {stable_mosaic.version = 11 : i64} {
  func.func @block_kernel(%arg0: memref<2x8x32xf32, #tpu.memory_space<vmem>>, %arg1: memref<32x256xf32, #tpu.memory_space<vmem>>, %arg2: memref<128x32xf32, #tpu.memory_space<vmem>>, %arg3: memref<4x128xf32, #tpu.memory_space<vmem>>, %arg4: memref<2x8x32xf32, #tpu.memory_space<vmem>>, %arg5: memref<2x4x8x8xf32, #tpu.memory_space<vmem>>) attributes {dimension_semantics = [], scalar_prefetch = 0 : i64, scratch_operands = 0 : i64, tpu.core_type = #tpu.core_type<tc>} {
    %c0 = arith.constant 0 : index
    %c0_0 = arith.constant 0 : index
    %c0_1 = arith.constant 0 : index
    %0 = vector.load %arg0[%c0, %c0_0, %c0_1] : memref<2x8x32xf32, #tpu.memory_space<vmem>>, vector<2x8x32xf32>
    %1 = vector.shape_cast %0 : vector<2x8x32xf32> to vector<16x32xf32>
    %c0_2 = arith.constant 0 : index
    %c0_3 = arith.constant 0 : index
    %2 = vector.load %arg1[%c0_2, %c0_3] : memref<32x256xf32, #tpu.memory_space<vmem>>, vector<32x96xf32>
    %c0_4 = arith.constant 0 : index
    %c96 = arith.constant 96 : index
    %3 = vector.load %arg1[%c0_4, %c96] : memref<32x256xf32, #tpu.memory_space<vmem>>, vector<32x32xf32>
    %c0_5 = arith.constant 0 : index
    %c128 = arith.constant 128 : index
    %4 = vector.load %arg1[%c0_5, %c128] : memref<32x256xf32, #tpu.memory_space<vmem>>, vector<32x128xf32>
    %c0_6 = arith.constant 0 : index
    %c0_7 = arith.constant 0 : index
    %5 = vector.load %arg3[%c0_6, %c0_7] : memref<4x128xf32, #tpu.memory_space<vmem>>, vector<1x32xf32>
    %c0_8 = arith.constant 0 : index
    %c32 = arith.constant 32 : index
    %6 = vector.load %arg3[%c0_8, %c32] : memref<4x128xf32, #tpu.memory_space<vmem>>, vector<1x32xf32>
    %c0_9 = arith.constant 0 : index
    %c64 = arith.constant 64 : index
    %7 = vector.load %arg3[%c0_9, %c64] : memref<4x128xf32, #tpu.memory_space<vmem>>, vector<1x32xf32>
    %c0_10 = arith.constant 0 : index
    %c96_11 = arith.constant 96 : index
    %8 = vector.load %arg3[%c0_10, %c96_11] : memref<4x128xf32, #tpu.memory_space<vmem>>, vector<1x32xf32>
    %c1 = arith.constant 1 : index
    %c0_12 = arith.constant 0 : index
    %9 = vector.load %arg3[%c1, %c0_12] : memref<4x128xf32, #tpu.memory_space<vmem>>, vector<1x32xf32>
    %c1_13 = arith.constant 1 : index
    %c32_14 = arith.constant 32 : index
    %10 = vector.load %arg3[%c1_13, %c32_14] : memref<4x128xf32, #tpu.memory_space<vmem>>, vector<1x32xf32>
    %c2 = arith.constant 2 : index
    %c0_15 = arith.constant 0 : index
    %11 = vector.load %arg3[%c2, %c0_15] : memref<4x128xf32, #tpu.memory_space<vmem>>, vector<1x96xf32>
    %c3 = arith.constant 3 : index
    %c0_16 = arith.constant 0 : index
    %12 = vector.load %arg3[%c3, %c0_16] : memref<4x128xf32, #tpu.memory_space<vmem>>, vector<1x128xf32>
    %cst = arith.constant dense<0.000000e+00> : vector<16xf32>
    %13 = vector.multi_reduction <add>, %1, %cst [1] : vector<16x32xf32> to vector<16xf32>
    %14 = vector.shape_cast %13 : vector<16xf32> to vector<16x1xf32>
    %cst_17 = arith.constant 3.200000e+01 : f32
    %15 = vector.broadcast %cst_17 : f32 to vector<16x1xf32>
    %16 = arith.divf %14, %15 : vector<16x1xf32>
    %17 = vector.broadcast %16 : vector<16x1xf32> to vector<16x32xf32>
    %18 = arith.subf %1, %17 : vector<16x32xf32>
    %19 = arith.mulf %18, %18 : vector<16x32xf32>
    %cst_18 = arith.constant dense<0.000000e+00> : vector<16xf32>
    %20 = vector.multi_reduction <add>, %19, %cst_18 [1] : vector<16x32xf32> to vector<16xf32>
    %21 = vector.shape_cast %20 : vector<16xf32> to vector<16x1xf32>
    %cst_19 = arith.constant 3.200000e+01 : f32
    %22 = vector.broadcast %cst_19 : f32 to vector<16x1xf32>
    %23 = arith.divf %21, %22 : vector<16x1xf32>
    %24 = vector.broadcast %16 : vector<16x1xf32> to vector<16x32xf32>
    %25 = arith.subf %1, %24 : vector<16x32xf32>
    %cst_20 = arith.constant 9.99999974E-6 : f32
    %26 = vector.broadcast %cst_20 : f32 to vector<16x1xf32>
    %27 = arith.addf %23, %26 : vector<16x1xf32>
    %28 = math.rsqrt %27 : vector<16x1xf32>
    %29 = vector.broadcast %28 : vector<16x1xf32> to vector<16x32xf32>
    %30 = arith.mulf %25, %29 : vector<16x32xf32>
    %31 = vector.broadcast %5 : vector<1x32xf32> to vector<16x32xf32>
    %32 = arith.mulf %30, %31 : vector<16x32xf32>
    %33 = vector.broadcast %6 : vector<1x32xf32> to vector<16x32xf32>
    %34 = arith.addf %32, %33 : vector<16x32xf32>
    %cst_21 = arith.constant dense<0.000000e+00> : vector<16x96xf32>
    %35 = tpu.matmul %34, %2, %cst_21 {dimension_numbers = #tpu.dot_dimension_numbers<[1], [0], [0], [1], [0, 0, 1, 1], [], []>} : vector<16x32xf32>, vector<32x96xf32>, vector<16x96xf32> -> vector<16x96xf32>
    %36 = vector.broadcast %11 : vector<1x96xf32> to vector<16x96xf32>
    %37 = arith.addf %35, %36 : vector<16x96xf32>
    %38 = vector.extract_strided_slice %37 {offsets = [0, 0], sizes = [16, 8], strides = [1, 1]} : vector<16x96xf32> to vector<16x8xf32>
    %39 = vector.shape_cast %38 : vector<16x8xf32> to vector<2x8x8xf32>
    %40 = vector.extract_strided_slice %37 {offsets = [0, 8], sizes = [16, 8], strides = [1, 1]} : vector<16x96xf32> to vector<16x8xf32>
    %41 = vector.shape_cast %40 : vector<16x8xf32> to vector<2x8x8xf32>
    %42 = vector.extract_strided_slice %37 {offsets = [0, 16], sizes = [16, 8], strides = [1, 1]} : vector<16x96xf32> to vector<16x8xf32>
    %43 = vector.shape_cast %42 : vector<16x8xf32> to vector<2x8x8xf32>
    %44 = vector.extract_strided_slice %37 {offsets = [0, 24], sizes = [16, 8], strides = [1, 1]} : vector<16x96xf32> to vector<16x8xf32>
    %45 = vector.shape_cast %44 : vector<16x8xf32> to vector<2x8x8xf32>
    %46 = vector.shape_cast %39 : vector<2x8x8xf32> to vector<2x1x8x8xf32>
    %47 = vector.shape_cast %41 : vector<2x8x8xf32> to vector<2x1x8x8xf32>
    %48 = vector.shape_cast %43 : vector<2x8x8xf32> to vector<2x1x8x8xf32>
    %49 = vector.shape_cast %45 : vector<2x8x8xf32> to vector<2x1x8x8xf32>
    %50 = tpu.concatenate %46, %47, %48, %49 in 1 : vector<2x1x8x8xf32>, vector<2x1x8x8xf32>, vector<2x1x8x8xf32>, vector<2x1x8x8xf32> -> vector<2x4x8x8xf32>
    %51 = vector.shape_cast %50 : vector<2x4x8x8xf32> to vector<8x8x8xf32>
    %52 = vector.extract_strided_slice %37 {offsets = [0, 32], sizes = [16, 8], strides = [1, 1]} : vector<16x96xf32> to vector<16x8xf32>
    %53 = vector.shape_cast %52 : vector<16x8xf32> to vector<2x8x8xf32>
    %54 = vector.extract_strided_slice %37 {offsets = [0, 40], sizes = [16, 8], strides = [1, 1]} : vector<16x96xf32> to vector<16x8xf32>
    %55 = vector.shape_cast %54 : vector<16x8xf32> to vector<2x8x8xf32>
    %56 = vector.extract_strided_slice %37 {offsets = [0, 48], sizes = [16, 8], strides = [1, 1]} : vector<16x96xf32> to vector<16x8xf32>
    %57 = vector.shape_cast %56 : vector<16x8xf32> to vector<2x8x8xf32>
    %58 = vector.extract_strided_slice %37 {offsets = [0, 56], sizes = [16, 8], strides = [1, 1]} : vector<16x96xf32> to vector<16x8xf32>
    %59 = vector.shape_cast %58 : vector<16x8xf32> to vector<2x8x8xf32>
    %60 = vector.shape_cast %53 : vector<2x8x8xf32> to vector<2x1x8x8xf32>
    %61 = vector.shape_cast %55 : vector<2x8x8xf32> to vector<2x1x8x8xf32>
    %62 = vector.shape_cast %57 : vector<2x8x8xf32> to vector<2x1x8x8xf32>
    %63 = vector.shape_cast %59 : vector<2x8x8xf32> to vector<2x1x8x8xf32>
    %64 = tpu.concatenate %60, %61, %62, %63 in 1 : vector<2x1x8x8xf32>, vector<2x1x8x8xf32>, vector<2x1x8x8xf32>, vector<2x1x8x8xf32> -> vector<2x4x8x8xf32>
    %65 = vector.shape_cast %64 : vector<2x4x8x8xf32> to vector<8x8x8xf32>
    %66 = vector.extract_strided_slice %37 {offsets = [0, 64], sizes = [16, 8], strides = [1, 1]} : vector<16x96xf32> to vector<16x8xf32>
    %67 = vector.shape_cast %66 : vector<16x8xf32> to vector<2x8x8xf32>
    %68 = vector.extract_strided_slice %37 {offsets = [0, 72], sizes = [16, 8], strides = [1, 1]} : vector<16x96xf32> to vector<16x8xf32>
    %69 = vector.shape_cast %68 : vector<16x8xf32> to vector<2x8x8xf32>
    %70 = vector.extract_strided_slice %37 {offsets = [0, 80], sizes = [16, 8], strides = [1, 1]} : vector<16x96xf32> to vector<16x8xf32>
    %71 = vector.shape_cast %70 : vector<16x8xf32> to vector<2x8x8xf32>
    %72 = vector.extract_strided_slice %37 {offsets = [0, 88], sizes = [16, 8], strides = [1, 1]} : vector<16x96xf32> to vector<16x8xf32>
    %73 = vector.shape_cast %72 : vector<16x8xf32> to vector<2x8x8xf32>
    %74 = vector.shape_cast %67 : vector<2x8x8xf32> to vector<2x1x8x8xf32>
    %75 = vector.shape_cast %69 : vector<2x8x8xf32> to vector<2x1x8x8xf32>
    %76 = vector.shape_cast %71 : vector<2x8x8xf32> to vector<2x1x8x8xf32>
    %77 = vector.shape_cast %73 : vector<2x8x8xf32> to vector<2x1x8x8xf32>
    %78 = tpu.concatenate %74, %75, %76, %77 in 1 : vector<2x1x8x8xf32>, vector<2x1x8x8xf32>, vector<2x1x8x8xf32>, vector<2x1x8x8xf32> -> vector<2x4x8x8xf32>
    %79 = vector.shape_cast %78 : vector<2x4x8x8xf32> to vector<8x8x8xf32>
    %80 = tpu.iota {dimensions = array<i32: 0>} : vector<8x8xi32>
    %81 = tpu.iota {dimensions = array<i32: 1>} : vector<8x8xi32>
    %82 = arith.cmpi sge, %80, %81 : vector<8x8xi32>
    "tpu.trace_start"() <{level = 10 : i32, message = "gtd,gsd->gts"}> : () -> ()
    %cst_22 = arith.constant dense<0.000000e+00> : vector<8x8x8xf32>
    %83 = tpu.matmul %51, %65, %cst_22 {dimension_numbers = #tpu.dot_dimension_numbers<[2], [2], [1], [1], [0, 0, 0, 1, 1, 1], [0], [0]>} : vector<8x8x8xf32>, vector<8x8x8xf32>, vector<8x8x8xf32> -> vector<8x8x8xf32>
    "tpu.trace_stop"() : () -> ()
    %84 = vector.shape_cast %82 : vector<8x8xi1> to vector<1x8x8xi1>
    %cst_23 = arith.constant -1.000000e+30 : f32
    %85 = vector.shape_cast %84 : vector<1x8x8xi1> to vector<1x8x8xi1>
    %86 = vector.broadcast %85 : vector<1x8x8xi1> to vector<8x8x8xi1>
    %87 = vector.broadcast %cst_23 : f32 to vector<8x8x8xf32>
    %88 = arith.select %86, %83, %87 : vector<8x8x8xi1>, vector<8x8x8xf32>
    %cst_24 = arith.constant dense<0xFF800000> : vector<8x8xf32>
    %89 = vector.multi_reduction <maximumf>, %88, %cst_24 [2] : vector<8x8x8xf32> to vector<8x8xf32>
    %90 = vector.shape_cast %89 : vector<8x8xf32> to vector<8x8x1xf32>
    %91 = vector.broadcast %90 : vector<8x8x1xf32> to vector<8x8x8xf32>
    %92 = arith.subf %88, %91 : vector<8x8x8xf32>
    %93 = math.exp %92 : vector<8x8x8xf32>
    %cst_25 = arith.constant dense<0.000000e+00> : vector<8x8xf32>
    %94 = vector.multi_reduction <add>, %93, %cst_25 [2] : vector<8x8x8xf32> to vector<8x8xf32>
    %95 = vector.shape_cast %94 : vector<8x8xf32> to vector<8x8x1xf32>
    %96 = tpu.reciprocal %95 {approx = true} : vector<8x8x1xf32> -> vector<8x8x1xf32>
    %97 = vector.broadcast %96 : vector<8x8x1xf32> to vector<8x8x8xf32>
    %98 = arith.mulf %93, %97 : vector<8x8x8xf32>
    %99 = vector.shape_cast %98 : vector<8x8x8xf32> to vector<2x4x8x8xf32>
    %c0_26 = arith.constant 0 : index
    %c0_27 = arith.constant 0 : index
    %c0_28 = arith.constant 0 : index
    %c0_29 = arith.constant 0 : index
    %100 = vector.load %arg5[%c0_26, %c0_27, %c0_28, %c0_29] : memref<2x4x8x8xf32, #tpu.memory_space<vmem>>, vector<2x4x8x8xf32>
    tpu.vector_store %arg5[%c0_26, %c0_27, %c0_28, %c0_29], %99 {strides = array<i32>} : memref<2x4x8x8xf32, #tpu.memory_space<vmem>>, vector<2x4x8x8xf32>,
    "tpu.trace_start"() <{level = 10 : i32, message = "gts,gsd->gtd"}> : () -> ()
    %cst_30 = arith.constant dense<0.000000e+00> : vector<8x8x8xf32>
    %101 = tpu.matmul %98, %79, %cst_30 {dimension_numbers = #tpu.dot_dimension_numbers<[2], [1], [1], [2], [0, 0, 0, 1, 1, 2], [0], [0]>} : vector<8x8x8xf32>, vector<8x8x8xf32>, vector<8x8x8xf32> -> vector<8x8x8xf32>
    "tpu.trace_stop"() : () -> ()
    %102 = vector.shape_cast %101 : vector<8x8x8xf32> to vector<2x4x8x8xf32>
    %103 = vector.extract_strided_slice %102 {offsets = [0, 0, 0, 0], sizes = [2, 1, 8, 8], strides = [1, 1, 1, 1]} : vector<2x4x8x8xf32> to vector<2x1x8x8xf32>
    %104 = vector.shape_cast %103 : vector<2x1x8x8xf32> to vector<2x8x8xf32>
    %105 = vector.shape_cast %104 : vector<2x8x8xf32> to vector<16x8xf32>
    %106 = vector.extract_strided_slice %102 {offsets = [0, 1, 0, 0], sizes = [2, 1, 8, 8], strides = [1, 1, 1, 1]} : vector<2x4x8x8xf32> to vector<2x1x8x8xf32>
    %107 = vector.shape_cast %106 : vector<2x1x8x8xf32> to vector<2x8x8xf32>
    %108 = vector.shape_cast %107 : vector<2x8x8xf32> to vector<16x8xf32>
    %109 = vector.extract_strided_slice %102 {offsets = [0, 2, 0, 0], sizes = [2, 1, 8, 8], strides = [1, 1, 1, 1]} : vector<2x4x8x8xf32> to vector<2x1x8x8xf32>
    %110 = vector.shape_cast %109 : vector<2x1x8x8xf32> to vector<2x8x8xf32>
    %111 = vector.shape_cast %110 : vector<2x8x8xf32> to vector<16x8xf32>
    %112 = vector.extract_strided_slice %102 {offsets = [0, 3, 0, 0], sizes = [2, 1, 8, 8], strides = [1, 1, 1, 1]} : vector<2x4x8x8xf32> to vector<2x1x8x8xf32>
    %113 = vector.shape_cast %112 : vector<2x1x8x8xf32> to vector<2x8x8xf32>
    %114 = vector.shape_cast %113 : vector<2x8x8xf32> to vector<16x8xf32>
    %115 = tpu.concatenate %105, %108, %111, %114 in 1 : vector<16x8xf32>, vector<16x8xf32>, vector<16x8xf32>, vector<16x8xf32> -> vector<16x32xf32>
    %cst_31 = arith.constant dense<0.000000e+00> : vector<16x32xf32>
    %116 = tpu.matmul %115, %3, %cst_31 {dimension_numbers = #tpu.dot_dimension_numbers<[1], [0], [0], [1], [0, 0, 1, 1], [], []>} : vector<16x32xf32>, vector<32x32xf32>, vector<16x32xf32> -> vector<16x32xf32>
    %117 = arith.addf %1, %116 : vector<16x32xf32>
    %118 = vector.broadcast %9 : vector<1x32xf32> to vector<16x32xf32>
    %119 = arith.addf %117, %118 : vector<16x32xf32>
    %cst_32 = arith.constant dense<0.000000e+00> : vector<16xf32>
    %120 = vector.multi_reduction <add>, %119, %cst_32 [1] : vector<16x32xf32> to vector<16xf32>
    %121 = vector.shape_cast %120 : vector<16xf32> to vector<16x1xf32>
    %cst_33 = arith.constant 3.200000e+01 : f32
    %122 = vector.broadcast %cst_33 : f32 to vector<16x1xf32>
    %123 = arith.divf %121, %122 : vector<16x1xf32>
    %124 = vector.broadcast %123 : vector<16x1xf32> to vector<16x32xf32>
    %125 = arith.subf %119, %124 : vector<16x32xf32>
    %126 = arith.mulf %125, %125 : vector<16x32xf32>
    %cst_34 = arith.constant dense<0.000000e+00> : vector<16xf32>
    %127 = vector.multi_reduction <add>, %126, %cst_34 [1] : vector<16x32xf32> to vector<16xf32>
    %128 = vector.shape_cast %127 : vector<16xf32> to vector<16x1xf32>
    %cst_35 = arith.constant 3.200000e+01 : f32
    %129 = vector.broadcast %cst_35 : f32 to vector<16x1xf32>
    %130 = arith.divf %128, %129 : vector<16x1xf32>
    %131 = vector.broadcast %123 : vector<16x1xf32> to vector<16x32xf32>
    %132 = arith.subf %119, %131 : vector<16x32xf32>
    %cst_36 = arith.constant 9.99999974E-6 : f32
    %133 = vector.broadcast %cst_36 : f32 to vector<16x1xf32>
    %134 = arith.addf %130, %133 : vector<16x1xf32>
    %135 = math.rsqrt %134 : vector<16x1xf32>
    %136 = vector.broadcast %135 : vector<16x1xf32> to vector<16x32xf32>
    %137 = arith.mulf %132, %136 : vector<16x32xf32>
    %138 = vector.broadcast %7 : vector<1x32xf32> to vector<16x32xf32>
    %139 = arith.mulf %137, %138 : vector<16x32xf32>
    %140 = vector.broadcast %8 : vector<1x32xf32> to vector<16x32xf32>
    %141 = arith.addf %139, %140 : vector<16x32xf32>
    %cst_37 = arith.constant dense<0.000000e+00> : vector<16x128xf32>
    %142 = tpu.matmul %141, %4, %cst_37 {dimension_numbers = #tpu.dot_dimension_numbers<[1], [0], [0], [1], [0, 0, 1, 1], [], []>} : vector<16x32xf32>, vector<32x128xf32>, vector<16x128xf32> -> vector<16x128xf32>
    %143 = vector.broadcast %12 : vector<1x128xf32> to vector<16x128xf32>
    %144 = arith.addf %142, %143 : vector<16x128xf32>
    %cst_38 = arith.constant 5.000000e-01 : f32
    %145 = vector.broadcast %cst_38 : f32 to vector<16x128xf32>
    %146 = arith.mulf %145, %144 : vector<16x128xf32>
    %cst_39 = arith.constant 2.000000e+00 : f32
    %147 = math.sqrt %cst_39 : f32
    %148 = vector.broadcast %147 : f32 to vector<16x128xf32>
    %149 = arith.divf %144, %148 : vector<16x128xf32>
    %150 = math.erf %149 : vector<16x128xf32>
    %cst_40 = arith.constant 1.000000e+00 : f32
    %151 = vector.broadcast %cst_40 : f32 to vector<16x128xf32>
    %152 = arith.addf %151, %150 : vector<16x128xf32>
    %153 = arith.mulf %146, %152 : vector<16x128xf32>
    %c0_41 = arith.constant 0 : index
    %c0_42 = arith.constant 0 : index
    %154 = vector.load %arg2[%c0_41, %c0_42] : memref<128x32xf32, #tpu.memory_space<vmem>>, vector<128x32xf32>
    %cst_43 = arith.constant dense<0.000000e+00> : vector<16x32xf32>
    %155 = tpu.matmul %153, %154, %cst_43 {dimension_numbers = #tpu.dot_dimension_numbers<[1], [0], [0], [1], [0, 0, 1, 1], [], []>} : vector<16x128xf32>, vector<128x32xf32>, vector<16x32xf32> -> vector<16x32xf32>
    %156 = vector.broadcast %10 : vector<1x32xf32> to vector<16x32xf32>
    %157 = arith.addf %155, %156 : vector<16x32xf32>
    %158 = arith.addf %119, %157 : vector<16x32xf32>
    %159 = vector.shape_cast %158 : vector<16x32xf32> to vector<2x8x32xf32>
    %c0_44 = arith.constant 0 : index
    %c0_45 = arith.constant 0 : index
    %c0_46 = arith.constant 0 : index
    %160 = vector.load %arg4[%c0_44, %c0_45, %c0_46] : memref<2x8x32xf32, #tpu.memory_space<vmem>>, vector<2x8x32xf32>
    tpu.vector_store %arg4[%c0_44, %c0_45, %c0_46], %159 {strides = array<i32>} : memref<2x8x32xf32, #tpu.memory_space<vmem>>, vector<2x8x32xf32>,
    return
  }
}

</mosaic_0001>

<bundles_post_ra>
// kernel: block_forward.1
= control target key start
LH: loop header
LB: loop body
LE: loop exit
PB: predicated region body
PF: predicated region fallthrough
CT: control target
= control target key end

     0   :  { %11 = vsyncpa [#allocation3], 0  ;;  %vm35_vm0 = vcmask 261120   ;;  %s2750_s0 = inlined_call_operand.vmem [shape: f32[2,8,32], index: 0, kind: input, shape index: {}]   ;;  %s2751_s1 = inlined_call_operand.vmem [shape: f32[32,256], index: 1, kind: input, shape index: {}]   ;;  %s2752_s2 = inlined_call_operand.vmem [shape: f32[128,32], index: 2, kind: input, shape index: {}]   ;;  %s2753_s3 = inlined_call_operand.vmem [shape: f32[4,128], index: 3, kind: input, shape index: {}]   ;;  %s2754_s4 = inlined_call_operand.hbm [shape: f32[2,8,32], index: 4, kind: output, shape index: {0}]   ;;  %s2755_s5 = inlined_call_operand.hbm [shape: f32[2,4,8,8], index: 5, kind: output, shape index: {1}]  }
   0x1   :  { %v2371_v0 = vld [vmem:[%s2750_s0] sm:$0xff]  ;;  %v2376_v1 = vld [vmem:[%s2750_s0 + $0x8] sm:$0xff] }
   0x2   :  { %12 = vsyncpa [#allocation5], 0  ;;  %v36_v2 = vsel %vm35_vm0, %v2371_v0, 0.0  ;;  %v39_v3 = vsel %vm35_vm0, %v2376_v1, 0.0  ;;  %v2385_v4 = vld [vmem:[%s2753_s3] ss:$0 sm:$0xff]  ;;  %v174_v57 = vlaneseq }
   0x3   :  { %37 = vadd.xlane.f32.xlu0 %v36_v2  ;;  %s2324_s24 = smov 96   ;;  %v2396_v15 = vld [vmem:[%s2751_s1] sm:$0xff]  ;;  %v2401_v16 = vld [vmem:[%s2751_s1 + $0x10] sm:$0xff]  ;;  %s2325_s9 = smov 120   ;;  %v2326_v42 = vmov 0.0   ;;  %vm2329_vm1 = vmmov 0  }
   0x4   :  { %v2222_v17 = vpack.i.bf16 %v2401_v16, %v2396_v15  ;;  %v2152_v18 = vpack.c.bf16 %v2401_v16, %v2396_v15  ;;  %v2410_v19 = vld [vmem:[%s2751_s1 + $0x20] sm:$0xff]  ;;  %v2415_v20 = vld [vmem:[%s2751_s1 + $0x30] sm:$0xff]  ;;  %2025 = vmatprep.subr.mxu0 %v2326_v42  ;;  %s2327_s10 = smov 104   ;;  %s2328_s11 = smov 112   ;;  %2027 = vmatprep.mubr.msk.f32.mxu0 %vm2329_vm1, %v2326_v42  ;;  %vm181_vm2 = vcmask 64512   ;;  %v175_v58 = vshrl.u32 %v174_v57, 7 }
   0x5   :  { %v2156_v21 = vpack.c.bf16 %v2415_v20, %v2410_v19  ;;  %v1903_v37 = vld [vmem:[%s2753_s3 + $0x2] ss:$0 sm:$0xff]  ;;  %v177_v59 = vand.u32 127, %v174_v57  ;;  %s2330_s12 = smov 64   ;;  %s2331_s13 = smov 32   ;;  %vm1528_vm4 = vcmask 130048  }
   0x6   :  { %2153 = vmatprep.subr.bf16.mxu1 %v2152_v18  ;;  %s2332_s14 = smov 8   ;;  %s2333_s15 = smov 16   ;;  %vm1531_vm5 = vcmask 195584  }
   0x7   :  { %40 = vadd.xlane.f32.xlu0 %v39_v3  ;;  %2155 = vmatpush3.bf16.msra.mxu1 %v2152_v18  ;;  %vm2518_vm3 = vcmp.ge.s32.totalorder %v175_v58, %v177_v59  ;;  %s2334_s16 = smov 24  }
   0x8   :  { %2157 = vmatprep.subr.bf16.mxu1 %v2156_v21 }
   0xb   :  { %2159 = vmatpush3.bf16.msra.mxu1 %v2156_v21 }
   0xc   :  { %2015 = vmatprep.subr.mxu1 %v2326_v42 }
  0x1d   :  { %70 = vrot.lane.b32.xlu0 %v2385_v4, %s2324_s24 }
  0x90   :  { %v38_v5 = vpop.xlane.xlu0 %37 }
  0x91   :  { %v43_v6 = vmul.f32 0.03125, %v38_v5 }
  0x93   :  { %v45_v7 = vsub.f32 %v2371_v0, %v43_v6 }
  0x94   :  { %v41_v8 = vpop.xlane.xlu0 %40 }
  0x95   :  { %v44_v9 = vmul.f32 0.03125, %v41_v8  ;;  %v47_v10 = vmul.f32 %v45_v7, %v45_v7 }
  0x97   :  { %v46_v11 = vsub.f32 %v2376_v1, %v44_v9  ;;  %v49_v12 = vsel %vm35_vm0, %v47_v10, 0.0 }
  0x98   :  { %50 = vadd.xlane.f32.xlu1 %v49_v12  ;;  %v71_v30 = vpop.permute.xlu0 %70 }
  0x99   :  { %v48_v13 = vmul.f32 %v46_v11, %v46_v11 }
  0x9b   :  { %v52_v14 = vsel %vm35_vm0, %v48_v13, 0.0 }
  0x9c   :  { %53 = vadd.xlane.f32.xlu1 %v52_v14 }
 0x125   :  { %v51_v22 = vpop.xlane.xlu1 %50 }
 0x126   :  { %v55_v23 = vmul.f32 0.03125, %v51_v22 }
 0x128   :  { %v57_v24 = vadd.f32 1e-05, %v55_v23 }
 0x129   :  { %v54_v25 = vpop.xlane.xlu1 %53 }
 0x12a   :  { %2232 = vrsqrt.f32 %v57_v24  ;;  %v56_v26 = vmul.f32 0.03125, %v54_v25 }
 0x12c   :  { %v58_v27 = vadd.f32 1e-05, %v56_v26 }
 0x12e   :  { %2234 = vrsqrt.f32 %v58_v27 }
 0x134   :  { %v2233_v28 = vpop.eup %2232 }
 0x135   :  { %v61_v29 = vmul.f32 %v2233_v28, %v45_v7 }
 0x137   :  { %v67_v31 = vmul.f32 %v2385_v4, %v61_v29 }
 0x138   :  { %v2235_v32 = vpop.eup %2234 }
 0x139   :  { %v62_v33 = vmul.f32 %v2235_v32, %v46_v11  ;;  %v73_v34 = vadd.f32 %v71_v30, %v67_v31 }
 0x13b   :  { %v68_v35 = vmul.f32 %v2385_v4, %v62_v33  ;;  %2012 = vmatprep.mubr.msk.f32.mxu1 %vm35_vm0, %v73_v34 }
 0x13d   :  { %v74_v36 = vadd.f32 %v71_v30, %v68_v35 }
 0x13f   :  { %2013 = vmatmul.mubr.msk.f32.vlgmr.msra.gmra.mrb[0].mxu1 %vm35_vm0, %v74_v36 }
 0x140   :  { %2017 = vmatprep.mubr.msk.f32.mxu1 %vm2329_vm1, %v2326_v42 }
 0x212   :  { %v2014_v38 = vpop.f32.mrb[0].mxu1 }
 0x213   :  { %v2426_v39 = vadd.f32 %v2014_v38, %v1903_v37  ;;  %v151_v40 = vpop.f32.mrb[1].mxu1 }
 0x214   :  { %v2428_v41 = vadd.f32 %v1903_v37, %v151_v40 }
 0x215   :  { %164 = vrot.lane.b32.xlu0 %v2426_v39, %s2325_s9 }
 0x216   :  { %162 = vrot.lane.b32.xlu1 %v2428_v41, %s2325_s9 }
 0x219   :  { %172 = vrot.lane.b32.xlu0 %v2426_v39, %s2327_s10 }
 0x21a   :  { %166 = vrot.lane.b32.xlu1 %v2428_v41, %s2328_s11 }
 0x21e   :  { %170 = vrot.lane.b32.xlu1 %v2428_v41, %s2327_s10 }
 0x222   :  { %168 = vrot.lane.b32.xlu1 %v2426_v39, %s2328_s11 }
 0x226   :  { %179 = vrot.lane.b32.xlu1 %v2428_v41, %s2324_s24 }
 0x287   :  { %v2458_v46 = vpop.permute.xlu0 %164 }
 0x288   :  { %v2444_v43 = vpop.permute.xlu1 %162 }
 0x289   :  { %256 = vrot.lane.b32.xlu0 %v2444_v43, %s2324_s24 }
 0x28b   :  { %v2466_v48 = vpop.permute.xlu0 %172 }
 0x28c   :  { %v2448_v44 = vpop.permute.xlu1 %166 }
 0x28d   :  { %332 = vrot.lane.b32.xlu1 %v2448_v44, %s2324_s24 }
 0x290   :  { %v2452_v45 = vpop.permute.xlu1 %170 }
 0x291   :  { %484 = vrot.lane.b32.xlu1 %v2426_v39, %s2324_s24  ;;  %408 = vrot.lane.b32.xlu0 %v2452_v45, %s2324_s24 }
 0x294   :  { %v2460_v47 = vpop.permute.xlu1 %168 }
 0x295   :  { %560 = vrot.lane.b32.xlu0 %v2458_v46, %s2324_s24  ;;  %636 = vrot.lane.b32.xlu1 %v2460_v47, %s2324_s24 }
 0x298   :  { %v180_v49 = vpop.permute.xlu1 %179 }
 0x299   :  { %712 = vrot.lane.b32.xlu0 %v2466_v48, %s2324_s24  ;;  %2016 = vmatpush3.xpose.msk.msra.mxu1 %vm181_vm2, %v180_v49 }
 0x29a   :  { %2020 = vmatprep.subr.mxu1 %v2326_v42 }
 0x29c   :  { %2018 = vmatmul.mubr.msk.f32.vlgmr.msra.gmra.mrb[2].mxu1 %vm181_vm2, %v2428_v41 }
 0x29d   :  { %2022 = vmatprep.mubr.msk.f32.mxu1 %vm2329_vm1, %v2326_v42 }
 0x2fb   :  { %v257_v50 = vpop.permute.xlu0 %256 }
 0x2fc   :  { %2021 = vmatpush3.xpose.msk.msra.mxu1 %vm181_vm2, %v257_v50 }
 0x2fd   :  { %2030 = vmatprep.subr.mxu1 %v2326_v42 }
 0x2ff   :  { %2023 = vmatmul.mubr.msk.f32.vlgmr.msra.gmra.mrb[4].mxu1 %vm181_vm2, %v2444_v43  ;;  %v333_v51 = vpop.permute.xlu1 %332 }
 0x300   :  { %2026 = vmatpush3.xpose.msk.msra.mxu0 %vm181_vm2, %v333_v51  ;;  %2032 = vmatprep.mubr.msk.f32.mxu1 %vm2329_vm1, %v2326_v42 }
 0x301   :  { %2035 = vmatprep.subr.mxu0 %v2326_v42 }
 0x303   :  { %v409_v52 = vpop.permute.xlu0 %408  ;;  %2028 = vmatmul.mubr.msk.f32.vlgmr.msra.gmra.mrb[0].mxu0 %vm181_vm2, %v2448_v44  ;;  %v485_v53 = vpop.permute.xlu1 %484 }
 0x304   :  { %2031 = vmatpush3.xpose.msk.msra.mxu1 %vm181_vm2, %v409_v52  ;;  %2036 = vmatpush3.xpose.msk.msra.mxu0 %vm181_vm2, %v485_v53 }
 0x305   :  { %2037 = vmatprep.mubr.msk.f32.mxu0 %vm2329_vm1, %v2326_v42  ;;  %2040 = vmatprep.subr.mxu1 %v2326_v42 }
 0x306   :  { %2045 = vmatprep.subr.mxu0 %v2326_v42 }
 0x307   :  { %v561_v54 = vpop.permute.xlu0 %560  ;;  %2033 = vmatmul.mubr.msk.f32.vlgmr.msra.gmra.mrb[6].mxu1 %vm181_vm2, %v2452_v45  ;;  %2038 = vmatmul.mubr.msk.f32.vlgmr.msra.gmra.mrb[2].mxu0 %vm181_vm2, %v2426_v39  ;;  %v637_v55 = vpop.permute.xlu1 %636 }
 0x308   :  { %2041 = vmatpush3.xpose.msk.msra.mxu1 %vm181_vm2, %v561_v54  ;;  %2046 = vmatpush3.xpose.msk.msra.mxu0 %vm181_vm2, %v637_v55 }
 0x309   :  { %2042 = vmatprep.mubr.msk.f32.mxu1 %vm2329_vm1, %v2326_v42  ;;  %2047 = vmatprep.mubr.msk.f32.mxu0 %vm2329_vm1, %v2326_v42 }
 0x30a   :  { %2050 = vmatprep.subr.mxu1 %v2326_v42  ;;  %2055 = vmatprep.subr.mxu0 %v2326_v42 }
 0x30b   :  { %v713_v56 = vpop.permute.xlu0 %712  ;;  %2043 = vmatmul.mubr.msk.f32.vlgmr.msra.gmra.mrb[8].mxu1 %vm181_vm2, %v2458_v46  ;;  %2048 = vmatmul.mubr.msk.f32.vlgmr.msra.gmra.mrb[4].mxu0 %vm181_vm2, %v2460_v47 }
 0x30c   :  { %2051 = vmatpush3.xpose.msk.msra.mxu1 %vm181_vm2, %v713_v56  ;;  %2052 = vmatprep.mubr.msk.f32.mxu1 %vm2329_vm1, %v2326_v42 }
 0x30d   :  { %2060 = vmatprep.subr.mxu1 %v2326_v42  ;;  %2057 = vmatprep.mubr.msk.f32.mxu0 %vm2329_vm1, %v2326_v42 }
 0x30f   :  { %2053 = vmatmul.mubr.msk.f32.vlgmr.msra.gmra.mrb[10].mxu1 %vm181_vm2, %v2466_v48 }
 0x310   :  { %2062 = vmatprep.mubr.msk.f32.mxu1 %vm2329_vm1, %v2326_v42 }
 0x36f   :  { %v252_v61 = vpop.f32.mrb[2].mxu1 }
 0x370   :  { %v790_v62 = vsel %vm2518_vm3, %v252_v61, -1e+30  ;;  %v2019_v63 = vpop.f32.mrb[3].mxu1 }
 0x371   :  { %v798_v2 = vsel %vm181_vm2, %v790_v62, -inf }
 0x372   :  { %799 = vmax.xlane.f32.xlu1 %v798_v2 }
 0x3d2   :  { %v328_v3 = vpop.f32.mrb[4].mxu1 }
 0x3d3   :  { %v791_v5 = vsel %vm2518_vm3, %v328_v3, -1e+30  ;;  %v2024_v6 = vpop.f32.mrb[5].mxu1 }
 0x3d4   :  { %v801_v7 = vsel %vm181_vm2, %v791_v5, -inf }
 0x3d5   :  { %802 = vmax.xlane.f32.xlu0 %v801_v7 }
 0x3d6   :  { %v404_v8 = vpop.f32.mrb[0].mxu0 }
 0x3d7   :  { %v792_v9 = vsel %vm2518_vm3, %v404_v8, -1e+30  ;;  %v2029_v10 = vpop.f32.mrb[1].mxu0 }
 0x3d8   :  { %v804_v11 = vsel %vm181_vm2, %v792_v9, -inf }
 0x3d9   :  { %805 = vmax.xlane.f32.xlu0 %v804_v11 }
 0x3da   :  { %v480_v12 = vpop.f32.mrb[6].mxu1  ;;  %v556_v13 = vpop.f32.mrb[2].mxu0 }
 0x3db   :  { %v793_v14 = vsel %vm2518_vm3, %v480_v12, -1e+30  ;;  %v794_v18 = vsel %vm2518_vm3, %v556_v13, -1e+30  ;;  %v2034_v21 = vpop.f32.mrb[7].mxu1  ;;  %v2039_v22 = vpop.f32.mrb[3].mxu0 }
 0x3dc   :  { %v807_v23 = vsel %vm181_vm2, %v793_v14, -inf  ;;  %v810_v24 = vsel %vm181_vm2, %v794_v18, -inf }
 0x3dd   :  { %808 = vmax.xlane.f32.xlu0 %v807_v23  ;;  %811 = vmax.xlane.f32.xlu1 %v810_v24 }
 0x3de   :  { %v632_v25 = vpop.f32.mrb[8].mxu1  ;;  %v708_v26 = vpop.f32.mrb[4].mxu0 }
 0x3df   :  { %v795_v27 = vsel %vm2518_vm3, %v632_v25, -1e+30  ;;  %v796_v28 = vsel %vm2518_vm3, %v708_v26, -1e+30  ;;  %v2044_v29 = vpop.f32.mrb[9].mxu1  ;;  %v2049_v30 = vpop.f32.mrb[5].mxu0 }
 0x3e0   :  { %v813_v31 = vsel %vm181_vm2, %v795_v27, -inf  ;;  %v816_v32 = vsel %vm181_vm2, %v796_v28, -inf }
 0x3e1   :  { %814 = vmax.xlane.f32.xlu0 %v813_v31  ;;  %817 = vmax.xlane.f32.xlu1 %v816_v32 }
 0x3e2   :  { %v784_v33 = vpop.f32.mrb[10].mxu1 }
 0x3e3   :  { %v797_v34 = vsel %vm2518_vm3, %v784_v33, -1e+30  ;;  %v2054_v35 = vpop.f32.mrb[11].mxu1 }
 0x3e4   :  { %v819_v36 = vsel %vm181_vm2, %v797_v34, -inf }
 0x3e5   :  { %820 = vmax.xlane.f32.xlu0 %v819_v36 }
 0x3f2   :  { %894 = vrot.lane.b32.xlu1 %v2428_v41, %s2330_s12 }
 0x3f6   :  { %1046 = vrot.lane.b32.xlu1 %v2448_v44, %s2330_s12 }
 0x3fa   :  { %1122 = vrot.lane.b32.xlu1 %v2452_v45, %s2330_s12 }
 0x3fb   :  { %970 = vrot.lane.b32.xlu0 %v2444_v43, %s2330_s12 }
 0x3fe   :  { %1198 = vrot.lane.b32.xlu1 %v2426_v39, %s2330_s12 }
 0x3ff   :  { %1274 = vrot.lane.b32.xlu0 %v2458_v46, %s2330_s12  ;;  %v800_v37 = vpop.xlane.xlu1 %799 }
 0x400   :  { %v822_v38 = vsub.f32 %v790_v62, %v800_v37 }
 0x402   :  { %v830_v40 = vmul.f32 1.442695, %v822_v38 }
 0x404   :  { %2236 = vpow2.f32 %v830_v40 }
 0x40e   :  { %v2558_v41 = vpop.eup %2236 }
 0x40f   :  { %v846_v44 = vsel %vm181_vm2, %v2558_v41, 0.0 }
 0x422   :  { %847 = vadd.xlane.f32.xlu1 %v846_v44 }
 0x462   :  { %v803_v45 = vpop.xlane.xlu0 %802 }
 0x463   :  { %v823_v49 = vsub.f32 %v791_v5, %v803_v45 }
 0x465   :  { %v832_v50 = vmul.f32 1.442695, %v823_v49 }
 0x466   :  { %v806_v43 = vpop.xlane.xlu0 %805 }
 0x467   :  { %2238 = vpow2.f32 %v832_v50  ;;  %v824_v51 = vsub.f32 %v792_v9, %v806_v43 }
 0x469   :  { %v834_v39 = vmul.f32 1.442695, %v824_v51 }
 0x46a   :  { %v809_v52 = vpop.xlane.xlu0 %808  ;;  %v812_v53 = vpop.xlane.xlu1 %811 }
 0x46b   :  { %2240 = vpow2.f32 %v834_v39  ;;  %v825_v46 = vsub.f32 %v793_v14, %v809_v52  ;;  %v826_v54 = vsub.f32 %v794_v18, %v812_v53 }
 0x46d   :  { %v836_v55 = vmul.f32 1.442695, %v825_v46  ;;  %v838_v56 = vmul.f32 1.442695, %v826_v54  ;;  %v2227_v54 = vpack.i.bf16 %v2415_v20, %v2410_v19 }
 0x46e   :  { %v815_v57 = vpop.xlane.xlu0 %814  ;;  %v818_v58 = vpop.xlane.xlu1 %817 }
 0x46f   :  { %2242 = vpow2.f32 %v836_v55  ;;  %v827_v59 = vsub.f32 %v795_v27, %v815_v57  ;;  %v828_v60 = vsub.f32 %v796_v28, %v818_v58 }
 0x470   :  { %2244 = vpow2.f32 %v838_v56 }
 0x471   :  { %v2239_v61 = vpop.eup %2238  ;;  %v840_v62 = vmul.f32 1.442695, %v827_v59  ;;  %v842_v63 = vmul.f32 1.442695, %v828_v60 }
 0x472   :  { %v821_v2 = vpop.xlane.xlu0 %820  ;;  %v895_v3 = vpop.permute.xlu1 %894  ;;  %v849_v5 = vsel %vm181_vm2, %v2239_v61, 0.0 }
 0x473   :  { %2246 = vpow2.f32 %v840_v62  ;;  %v829_v6 = vsub.f32 %v797_v34, %v821_v2  ;;  %850 = vadd.xlane.f32.xlu0 %v849_v5  ;;  %2056 = vmatpush3.msra.mxu0 %v895_v3 }
 0x474   :  { %2248 = vpow2.f32 %v842_v63  ;;  %2065 = vmatprep.subr.mxu0 %v2326_v42 }
 0x475   :  { %v2241_v7 = vpop.eup %2240  ;;  %v844_v8 = vmul.f32 1.442695, %v829_v6 }
 0x476   :  { %v971_v9 = vpop.permute.xlu0 %970  ;;  %v852_v10 = vsel %vm181_vm2, %v2241_v7, 0.0  ;;  %v1047_v26 = vpop.permute.xlu1 %1046 }
 0x477   :  { %2250 = vpow2.f32 %v844_v8  ;;  %2061 = vmatpush3.msra.mxu1 %v971_v9  ;;  %853 = vadd.xlane.f32.xlu1 %v852_v10 }
 0x478   :  { %2070 = vmatprep.subr.mxu1 %v2326_v42 }
 0x479   :  { %v2243_v11 = vpop.eup %2242 }
 0x47a   :  { %v2245_v12 = vpop.eup %2244  ;;  %v855_v13 = vsel %vm181_vm2, %v2243_v11, 0.0  ;;  %v1123_v27 = vpop.permute.xlu1 %1122 }
 0x47b   :  { %856 = vadd.xlane.f32.xlu0 %v855_v13  ;;  %v858_v14 = vsel %vm181_vm2, %v2245_v12, 0.0 }
 0x47c   :  { %859 = vadd.xlane.f32.xlu1 %v858_v14 }
 0x47d   :  { %v2568_v18 = vpop.eup %2246 }
 0x47e   :  { %v2570_v21 = vpop.eup %2248  ;;  %v861_v22 = vsel %vm181_vm2, %v2568_v18, 0.0  ;;  %v1199_v28 = vpop.permute.xlu1 %1198 }
 0x47f   :  { %862 = vadd.xlane.f32.xlu0 %v861_v22  ;;  %v864_v23 = vsel %vm181_vm2, %v2570_v21, 0.0 }
 0x480   :  { %865 = vadd.xlane.f32.xlu1 %v864_v23 }
 0x481   :  { %v2576_v24 = vpop.eup %2250 }
 0x482   :  { %v867_v25 = vsel %vm181_vm2, %v2576_v24, 0.0 }
 0x483   :  { %868 = vadd.xlane.f32.xlu0 %v867_v25 }
 0x491   :  { %1350 = vrot.lane.b32.xlu1 %v2460_v47, %s2330_s12  ;;  %v1275_v47 = vpop.permute.xlu0 %1274 }
 0x495   :  { %2223 = vrot.lane.b32.xlu1 %v2222_v17, %s2331_s13 }
 0x499   :  { %1426 = vrot.lane.b32.xlu0 %v2466_v48, %s2330_s12 }
 0x49d   :  { %2228 = vrot.lane.b32.xlu0 %v2227_v54, %s2331_s13  ;;  %v1773_v54 = vld [vmem:[%s2752_s2 + $0x10] sm:$0xff] }
 0x4af   :  { %v848_v29 = vpop.xlane.xlu1 %847 }
 0x4b0   :  { %2252 = vrcp.f32 %v848_v29 }
 0x4ba   :  { %v2253_v30 = vpop.eup %2252 }
 0x4bb   :  { %v878_v31 = vmul.f32 %v2253_v30, %v2558_v41 }
 0x4bd   :  { %886 = vst.msk [vmem:[#allocation4] sm:$0xff] %vm181_vm2, %v878_v31  ;;  %2058 = vmatmul.mubr.msk.f32.vlgmr.msra.gmra.mrb[6].mxu0 %vm181_vm2, %v878_v31 }
 0x4be   :  { %2066 = vmatpush3.msra.mxu0 %v1047_v26  ;;  %2067 = vmatprep.mubr.msk.f32.mxu0 %vm2329_vm1, %v2326_v42 }
 0x4bf   :  { %2075 = vmatprep.subr.mxu0 %v2326_v42 }
 0x500   :  { %v851_v48 = vpop.xlane.xlu0 %850 }
 0x501   :  { %2254 = vrcp.f32 %v851_v48 }
 0x504   :  { %v854_v32 = vpop.xlane.xlu1 %853 }
 0x505   :  { %2256 = vrcp.f32 %v854_v32 }
 0x508   :  { %v857_v33 = vpop.xlane.xlu0 %856 }
 0x509   :  { %2258 = vrcp.f32 %v857_v33  ;;  %v860_v34 = vpop.xlane.xlu1 %859 }
 0x50a   :  { %2260 = vrcp.f32 %v860_v34 }
 0x50b   :  { %v2255_v35 = vpop.eup %2254 }
 0x50c   :  { %v879_v36 = vmul.f32 %v2255_v35, %v2239_v61  ;;  %v863_v37 = vpop.xlane.xlu0 %862 }
 0x50d   :  { %2262 = vrcp.f32 %v863_v37  ;;  %v866_v38 = vpop.xlane.xlu1 %865 }
 0x50e   :  { %887 = vst.msk [vmem:[#allocation4 + $0x8] sm:$0xff] %vm181_vm2, %v879_v36  ;;  %2264 = vrcp.f32 %v866_v38  ;;  %2063 = vmatmul.mubr.msk.f32.vlgmr.msra.gmra.mrb[12].mxu1 %vm181_vm2, %v879_v36 }
 0x50f   :  { %v2257_v40 = vpop.eup %2256  ;;  %2071 = vmatpush3.msra.mxu1 %v1123_v27  ;;  %2072 = vmatprep.mubr.msk.f32.mxu1 %vm2329_vm1, %v2326_v42 }
 0x510   :  { %v880_v41 = vmul.f32 %v2257_v40, %v2241_v7  ;;  %v869_v44 = vpop.xlane.xlu0 %868  ;;  %2080 = vmatprep.subr.mxu1 %v2326_v42 }
 0x511   :  { %2266 = vrcp.f32 %v869_v44  ;;  %v1351_v39 = vpop.permute.xlu1 %1350 }
 0x512   :  { %888 = vst.msk [vmem:[#allocation4 + $0x10] sm:$0xff] %vm181_vm2, %v880_v41  ;;  %2068 = vmatmul.mubr.msk.f32.vlgmr.msra.gmra.mrb[8].mxu0 %vm181_vm2, %v880_v41 }
 0x513   :  { %v2259_v45 = vpop.eup %2258  ;;  %2076 = vmatpush3.msra.mxu0 %v1199_v28  ;;  %2077 = vmatprep.mubr.msk.f32.mxu0 %vm2329_vm1, %v2326_v42 }
 0x514   :  { %v2261_v49 = vpop.eup %2260  ;;  %v881_v50 = vmul.f32 %v2259_v45, %v2243_v11  ;;  %2085 = vmatprep.subr.mxu0 %v2326_v42  ;;  %v1427_v52 = vpop.permute.xlu0 %1426 }
 0x515   :  { %v882_v43 = vmul.f32 %v2261_v49, %v2245_v12  ;;  %v2224_v55 = vpop.permute.xlu1 %2223 }
 0x516   :  { %889 = vst.msk [vmem:[#allocation4 + $0x18] sm:$0xff] %vm181_vm2, %v881_v50  ;;  %2073 = vmatmul.mubr.msk.f32.vlgmr.msra.gmra.mrb[14].mxu1 %vm181_vm2, %v881_v50  ;;  %v2226_v56 = vunpack.i.h.bf16 %v2224_v55  ;;  %v2225_v57 = vunpack.i.l.bf16 %v2224_v55 }
 0x517   :  { %v2263_v51 = vpop.eup %2262  ;;  %890 = vst.msk [vmem:[#allocation4 + $0x20] sm:$0xff] %vm181_vm2, %v882_v43  ;;  %2078 = vmatmul.mubr.msk.f32.vlgmr.msra.gmra.mrb[10].mxu0 %vm181_vm2, %v882_v43  ;;  %2081 = vmatpush3.msra.mxu1 %v1275_v47  ;;  %v1932_v47 = vld [vmem:[%s2753_s3 + $0x1] ss:$0 sm:$0xff] }
 0x518   :  { %v2265_v15 = vpop.eup %2264  ;;  %v883_v16 = vmul.f32 %v2263_v51, %v2568_v18  ;;  %2086 = vmatpush3.msra.mxu0 %v1351_v39  ;;  %2082 = vmatprep.mubr.msk.f32.mxu1 %vm2329_vm1, %v2326_v42  ;;  %v2160_v58 = vpack.c.bf16 %v2226_v56, %v2225_v57  ;;  %v2229_v61 = vpop.permute.xlu0 %2228  ;;  %v27_v39 = vld [vmem:[%s2751_s1 + $0x8] sm:$0xff]  ;;  %v1774_v56 = vld [vmem:[%s2752_s2 + $0x18] sm:$0xff] }
 0x519   :  { %v884_v17 = vmul.f32 %v2265_v15, %v2570_v21  ;;  %2087 = vmatprep.mubr.msk.f32.mxu0 %vm2329_vm1, %v2326_v42  ;;  %2090 = vmatprep.subr.mxu1 %v2326_v42  ;;  %v2231_v62 = vunpack.i.h.bf16 %v2229_v61  ;;  %v28_v15 = vld [vmem:[%s2751_s1 + $0x18] sm:$0xff]  ;;  %v2180_v57 = vpack.c.bf16 %v1774_v56, %v1773_v54 }
 0x51a   :  { %891 = vst.msk [vmem:[#allocation4 + $0x28] sm:$0xff] %vm181_vm2, %v883_v16  ;;  %2083 = vmatmul.mubr.msk.f32.vlgmr.msra.gmra.mrb[16].mxu1 %vm181_vm2, %v883_v16  ;;  %v2168_v16 = vpack.c.bf16 %v28_v15, %v27_v39 }
 0x51b   :  { %v2267_v53 = vpop.eup %2266  ;;  %892 = vst.msk [vmem:[#allocation4 + $0x30] sm:$0xff] %vm181_vm2, %v884_v17  ;;  %2088 = vmatmul.mubr.msk.f32.vlgmr.msra.gmra.mrb[12].mxu0 %vm181_vm2, %v884_v17  ;;  %2091 = vmatpush3.msra.mxu1 %v1427_v52  ;;  %v29_v17 = vld [vmem:[%s2751_s1 + $0x28] sm:$0xff]  ;;  %v30_v52 = vld [vmem:[%s2751_s1 + $0x38] sm:$0xff] }
 0x51c   :  { %v885_v46 = vmul.f32 %v2267_v53, %v2576_v24  ;;  %2092 = vmatprep.mubr.msk.f32.mxu1 %vm2329_vm1, %v2326_v42  ;;  %2161 = vmatprep.subr.bf16.mxu1 %v2160_v58  ;;  %v2230_v42 = vunpack.i.l.bf16 %v2229_v61  ;;  %v1771_v53 = vld [vmem:[%s2752_s2] sm:$0xff] }
 0x51e   :  { %893 = vst.msk [vmem:[#allocation4 + $0x38] sm:$0xff] %vm181_vm2, %v885_v46  ;;  %2093 = vmatmul.mubr.msk.f32.vlgmr.msra.gmra.mrb[18].mxu1 %vm181_vm2, %v885_v46  ;;  %v2164_v63 = vpack.c.bf16 %v2231_v62, %v2230_v42  ;;  %v1772_v46 = vld [vmem:[%s2752_s2 + $0x8] sm:$0xff] }
 0x51f   :  { %2163 = vmatpush3.bf16.msra.mxu1 %v2160_v58  ;;  %v2176_v55 = vpack.c.bf16 %v1772_v46, %v1771_v53  ;;  %v1775_v58 = vld [vmem:[%s2752_s2 + $0x20] sm:$0xff] }
 0x520   :  { %2165 = vmatprep.subr.bf16.mxu1 %v2164_v63 }
 0x521   :  { %2177 = vmatprep.subr.bf16.mxu0 %v2176_v55 }
 0x522   :  { %2179 = vmatpush3.bf16.msra.mxu0 %v2176_v55 }
 0x523   :  { %2167 = vmatpush3.bf16.msra.mxu1 %v2164_v63  ;;  %2181 = vmatprep.subr.bf16.mxu0 %v2180_v57 }
 0x524   :  { %2169 = vmatprep.subr.bf16.mxu1 %v2168_v16 }
 0x526   :  { %2183 = vmatpush3.bf16.msra.mxu0 %v2180_v57 }
 0x590   :  { %v966_v59 = vpop.f32.mrb[6].mxu0 }
 0x591   :  { %v2059_v60 = vpop.f32.mrb[7].mxu0 }
 0x5e1   :  { %v1042_v2 = vpop.f32.mrb[12].mxu1 }
 0x5e2   :  { %v2064_v3 = vpop.f32.mrb[13].mxu1  ;;  %1504 = vrot.lane.b32.xlu1 %v1042_v2, %s2332_s14 }
 0x5e5   :  { %v1118_v19 = vpop.f32.mrb[8].mxu0 }
 0x5e6   :  { %1512 = vrot.lane.b32.xlu1 %v1118_v19, %s2333_s15  ;;  %v2069_v20 = vpop.f32.mrb[9].mxu0 }
 0x5e9   :  { %v1194_v5 = vpop.f32.mrb[14].mxu1 }
 0x5ea   :  { %v1270_v6 = vpop.f32.mrb[10].mxu0  ;;  %v2074_v7 = vpop.f32.mrb[15].mxu1  ;;  %1520 = vrot.lane.b32.xlu1 %v1194_v5, %s2334_s16 }
 0x5eb   :  { %v2079_v8 = vpop.f32.mrb[11].mxu0 }
 0x5ed   :  { %v1346_v9 = vpop.f32.mrb[16].mxu1 }
 0x5ee   :  { %v1422_v10 = vpop.f32.mrb[12].mxu0  ;;  %1506 = vrot.lane.b32.xlu0 %v1346_v9, %s2332_s14  ;;  %v2084_v11 = vpop.f32.mrb[17].mxu1 }
 0x5ef   :  { %v2089_v12 = vpop.f32.mrb[13].mxu0 }
 0x5f1   :  { %v1498_v13 = vpop.f32.mrb[18].mxu1 }
 0x5f2   :  { %v2094_v14 = vpop.f32.mrb[19].mxu1  ;;  %1514 = vrot.lane.b32.xlu0 %v1422_v10, %s2333_s15 }
 0x5f3   :  { %v1778_v14 = vld [vmem:[%s2752_s2 + $0x38] sm:$0xff] }
 0x5f6   :  { %1522 = vrot.lane.b32.xlu0 %v1498_v13, %s2334_s16  ;;  %v1777_v13 = vld [vmem:[%s2752_s2 + $0x30] sm:$0xff] }
 0x654   :  { %v1505_v18 = vpop.permute.xlu1 %1504 }
 0x655   :  { %v1526_v22 = vsel %vm181_vm2, %v966_v59, %v1505_v18  ;;  %v1776_v59 = vld [vmem:[%s2752_s2 + $0x28] sm:$0xff]  ;;  %v2188_v18 = vpack.c.bf16 %v1778_v14, %v1777_v13 }
 0x656   :  { %v2184_v60 = vpack.c.bf16 %v1776_v59, %v1775_v58 }
 0x658   :  { %v1513_v21 = vpop.permute.xlu1 %1512  ;;  %2185 = vmatprep.subr.bf16.mxu0 %v2184_v60 }
 0x659   :  { %v1529_v23 = vsel %vm1528_vm4, %v1526_v22, %v1513_v21  ;;  %2187 = vmatpush3.bf16.msra.mxu0 %v2184_v60  ;;  %v1779_v21 = vld [vmem:[%s2752_s2 + $0x40] sm:$0xff]  ;;  %v1780_v22 = vld [vmem:[%s2752_s2 + $0x48] sm:$0xff] }
 0x65a   :  { %2189 = vmatprep.subr.bf16.mxu0 %v2188_v18 }
 0x65c   :  { %v1521_v24 = vpop.permute.xlu1 %1520 }
 0x65d   :  { %v1532_v25 = vsel %vm1531_vm5, %v1529_v23, %v1521_v24  ;;  %2191 = vmatpush3.bf16.msra.mxu0 %v2188_v18  ;;  %v2192_v23 = vpack.c.bf16 %v1780_v22, %v1779_v21  ;;  %v1781_v24 = vld [vmem:[%s2752_s2 + $0x50] sm:$0xff] }
 0x65e   :  { %2103 = vmatprep.mubr.msk.f32.mxu1 %vm35_vm0, %v1532_v25  ;;  %v1782_v25 = vld [vmem:[%s2752_s2 + $0x58] sm:$0xff] }
 0x65f   :  { %2193 = vmatprep.subr.bf16.mxu0 %v2192_v23 }
 0x660   :  { %v1507_v26 = vpop.permute.xlu0 %1506 }
 0x661   :  { %v1527_v28 = vsel %vm181_vm2, %v1270_v6, %v1507_v26  ;;  %2195 = vmatpush3.bf16.msra.mxu0 %v2192_v23  ;;  %v2196_v26 = vpack.c.bf16 %v1782_v25, %v1781_v24 }
 0x663   :  { %2197 = vmatprep.subr.bf16.mxu0 %v2196_v26 }
 0x664   :  { %v1515_v27 = vpop.permute.xlu0 %1514 }
 0x665   :  { %v1530_v29 = vsel %vm1528_vm4, %v1527_v28, %v1515_v27  ;;  %2199 = vmatpush3.bf16.msra.mxu0 %v2196_v26  ;;  %v1783_v27 = vld [vmem:[%s2752_s2 + $0x60] sm:$0xff]  ;;  %v1784_v28 = vld [vmem:[%s2752_s2 + $0x68] sm:$0xff] }
 0x668   :  { %v1523_v30 = vpop.permute.xlu0 %1522 }
 0x669   :  { %v1533_v31 = vsel %vm1531_vm5, %v1530_v29, %v1523_v30  ;;  %v2200_v29 = vpack.c.bf16 %v1784_v28, %v1783_v27  ;;  %v1785_v30 = vld [vmem:[%s2752_s2 + $0x70] sm:$0xff] }
 0x66a   :  { %2104 = vmatmul.mubr.msk.f32.vlgmr.msra.gmra.mrb[20].mxu1 %vm35_vm0, %v1533_v31  ;;  %v1786_v31 = vld [vmem:[%s2752_s2 + $0x78] sm:$0xff]  ;;  %s2335_s2 = smov [#allocation4]  }
 0x66b   :  { %2171 = vmatpush3.bf16.msra.mxu1 %v2168_v16  ;;  %2201 = vmatprep.subr.bf16.mxu0 %v2200_v29 }
 0x66c   :  { %2203 = vmatpush3.bf16.msra.mxu0 %v2200_v29 }
 0x73d   :  { %v2105_v48 = vpop.f32.mrb[20].mxu1 }
 0x73e   :  { %v1632_v32 = vadd.f32 %v2105_v48, %v2376_v1  ;;  %v1622_v33 = vpop.f32.mrb[21].mxu1  ;;  %v1933_v48 = vld [vmem:[%s2753_s3 + $0x3] ss:$0 sm:$0xff]  ;;  %s1887_s3 = sshll.u32 %s2335_s2, 4  ;;  %s1888_s3 = int_to_ptr.vmem [resolvable:$true] %s1887_s3 }
 0x73f   :  { %v1631_v34 = vadd.f32 %v1622_v33, %v2371_v0  ;;  %s2276_s1 = scalar_lea.vmem %s1888_s3, 1024  ;;  %p2281_p1 = scmp.lt.s32.totalorder %s1888_s3, %s1888_s3 }
 0x740   :  { %v2638_v35 = vadd.f32 %v1932_v47, %v1632_v32  ;;  %p2277_p0 = scmp.ne.s32.totalorder %s1888_s3, %s2276_s1  ;;  %p2282_p2 = scmp.lt.s32.totalorder %s2276_s1, %s2276_s1 }
 0x741   :  { %v2640_v36 = vadd.f32 %v1932_v47, %v1631_v34 }
 0x742   :  { %v1642_v37 = vsel %vm35_vm0, %v2638_v35, 0.0  ;;  %p2283_p3 = por %p2282_p2, %p2281_p1 }
 0x743   :  { %1643 = vadd.xlane.f32.xlu0 %v1642_v37  ;;  %v1639_v38 = vsel %vm35_vm0, %v2640_v36, 0.0 }
 0x744   :  { %1640 = vadd.xlane.f32.xlu1 %v1639_v38  ;;  %p2284_p4 = pnand %p2283_p3, %p2277_p0 }
 0x755   :  { %1665 = vrot.lane.b32.xlu1 %v2385_v4, %s2330_s12 }
 0x759   :  { %1788 = vrot.lane.b32.xlu1 %v1932_v47, %s2324_s24  ;;  %v2204_v47 = vpack.c.bf16 %v1786_v31, %v1785_v30 }
 0x75b   :  { %2205 = vmatprep.subr.bf16.mxu0 %v2204_v47 }
 0x75c   :  { %2207 = vmatpush3.bf16.msra.mxu0 %v2204_v47 }
 0x7d0   :  { %v1644_v1 = vpop.xlane.xlu0 %1643 }
 0x7d1   :  { %v1646_v40 = vmul.f32 0.03125, %v1644_v1  ;;  %v1641_v0 = vpop.xlane.xlu1 %1640 }
 0x7d2   :  { %v1645_v41 = vmul.f32 0.03125, %v1641_v0 }
 0x7d3   :  { %v1648_v44 = vsub.f32 %v2638_v35, %v1646_v40 }
 0x7d4   :  { %v1647_v45 = vsub.f32 %v2640_v36, %v1645_v41 }
 0x7d5   :  { %v1650_v43 = vmul.f32 %v1648_v44, %v1648_v44  ;;  %v1666_v20 = vpop.permute.xlu1 %1665 }
 0x7d6   :  { %v1649_v49 = vmul.f32 %v1647_v45, %v1647_v45 }
 0x7d7   :  { %v1654_v51 = vsel %vm35_vm0, %v1650_v43, 0.0 }
 0x7d8   :  { %v1651_v50 = vsel %vm35_vm0, %v1649_v49, 0.0 }
 0x7d9   :  { %1652 = vadd.xlane.f32.xlu0 %v1651_v50 }
 0x7dd   :  { %1655 = vadd.xlane.f32.xlu0 %v1654_v51 }
 0x7f3   :  { %1670 = vrot.lane.b32.xlu0 %v2385_v4, %s2331_s13  ;;  %v2172_v4 = vpack.c.bf16 %v30_v52, %v29_v17 }
 0x7f5   :  { %2173 = vmatprep.subr.bf16.mxu1 %v2172_v4 }
 0x7f6   :  { %2175 = vmatpush3.bf16.msra.mxu1 %v2172_v4 }
 0x866   :  { %v1653_v61 = vpop.xlane.xlu0 %1652 }
 0x867   :  { %v1657_v62 = vmul.f32 0.03125, %v1653_v61 }
 0x869   :  { %v1659_v42 = vadd.f32 1e-05, %v1657_v62 }
 0x86a   :  { %v1656_v63 = vpop.xlane.xlu0 %1655 }
 0x86b   :  { %2268 = vrsqrt.f32 %v1659_v42  ;;  %v1658_v2 = vmul.f32 0.03125, %v1656_v63 }
 0x86d   :  { %v1660_v3 = vadd.f32 1e-05, %v1658_v2 }
 0x86e   :  { %v1671_v6 = vpop.permute.xlu0 %1670 }
 0x86f   :  { %2270 = vrsqrt.f32 %v1660_v3 }
 0x875   :  { %v2269_v19 = vpop.eup %2268 }
 0x876   :  { %v1663_v5 = vmul.f32 %v2269_v19, %v1647_v45 }
 0x878   :  { %v1668_v7 = vmul.f32 %v1666_v20, %v1663_v5 }
 0x879   :  { %v2271_v8 = vpop.eup %2270 }
 0x87a   :  { %v1664_v9 = vmul.f32 %v2271_v8, %v1648_v44  ;;  %v1673_v10 = vadd.f32 %v1671_v6, %v1668_v7 }
 0x87c   :  { %v1669_v11 = vmul.f32 %v1666_v20, %v1664_v9  ;;  %2114 = vmatprep.mubr.msk.f32.mxu1 %vm35_vm0, %v1673_v10 }
 0x87e   :  { %v1674_v12 = vadd.f32 %v1671_v6, %v1669_v11 }
 0x880   :  { %2115 = vmatmul.mubr.msk.f32.vlgmr.msra.gmra.mrb[22].mxu1 %vm35_vm0, %v1674_v12 }
 0x953   :  { %v2116_v32 = vpop.f32.mrb[22].mxu1 }
 0x954   :  { %v1757_v33 = vadd.f32 %v2116_v32, %v1933_v48  ;;  %v1751_v34 = vpop.f32.mrb[23].mxu1 }
 0x955   :  { %v1752_v37 = vadd.f32 %v1933_v48, %v1751_v34 }
 0x956   :  { %v1764_v38 = vmul.f32 0.70710677, %v1757_v33  ;;  %v1761_v49 = vmul.f32 0.5, %v1757_v33 }
 0x957   :  { %v1763_v1 = vmul.f32 0.70710677, %v1752_v37  ;;  %v1760_v44 = vmul.f32 0.5, %v1752_v37 }
 0x958   :  { %2272 = verf.f32 %v1764_v38 }
 0x959   :  { %2274 = verf.f32 %v1763_v1 }
 0x962   :  { %v2273_v40 = vpop.eup %2272 }
 0x963   :  { %v2275_v0 = vpop.eup %2274  ;;  %v1768_v41 = vadd.f32 1.0, %v2273_v40 }
 0x964   :  { %v1767_v45 = vadd.f32 1.0, %v2275_v0 }
 0x965   :  { %v1770_v43 = vmul.f32 %v1768_v41, %v1761_v49 }
 0x966   :  { %v1769_v50 = vmul.f32 %v1767_v45, %v1760_v44 }
 0x968   :  { %2149 = vmatprep.mubr.f32.mxu0 %v1769_v50 }
 0x969   :  { %2150 = vmatmul.mubr.f32.vlgmr.msra.gmra.mrb[14].mxu0 %v1770_v43 }
 0x96a   :  { %2287 = shalt.err (!%p2284_p4)
}
 0x96b   :  { %s2288_s11 = scalar_lea.hbm %s2755_s5, 1024 }
 0x96c   :  { %p2289_p5 = scmp.ne.s32.totalorder %s2755_s5, %s2288_s11  ;;  %p2292_p6 = scmp.lt.u32.totalorder %s2288_s11, %s2755_s5 }
 0x96e   :  { %p2294_p7 = pnand %p2292_p6, %p2289_p5 }
 0x970   :  { %2297 = shalt.err (!%p2294_p7)
}
 0x971   :  { %s2336_s17 = smov 128   ;;  %v1789_v51 = vpop.permute.xlu1 %1788  ;;  %s2337_s20 = smov [#allocation2]  }
 0x972   :  { %1893 = dma.vmem_to_hbm [thread:$0]  %s1888_s3, 1024, %s2755_s5, [#allocation5], %s2336_s17, %s2336_s17, %s2332_s14  }
 0x973   :  { %s1875_s21 = sshll.u32 %s2337_s20, 4  ;;  %s1876_s21 = int_to_ptr.vmem [resolvable:$true] %s1875_s21 }
 0x974   :  { %s2298_s22 = scalar_lea.vmem %s1876_s21, 256  ;;  %p2303_p9 = scmp.lt.s32.totalorder %s1876_s21, %s1876_s21 }
 0x975   :  { %p2299_p8 = scmp.ne.s32.totalorder %s1876_s21, %s2298_s22  ;;  %p2304_p10 = scmp.lt.s32.totalorder %s2298_s22, %s2298_s22 }
 0x977   :  { %p2305_p11 = por %p2304_p10, %p2303_p9 }
 0x979   :  { %p2306_p12 = pnand %p2305_p11, %p2299_p8 }
 0xa3c   :  { %v2151_v39 = vpop.f32.mrb[14].mxu0 }
 0xa3d   :  { %v1863_v15 = vadd.f32 %v2151_v39, %v1789_v51  ;;  %v1857_v16 = vpop.f32.mrb[15].mxu0 }
 0xa3e   :  { %v1858_v17 = vadd.f32 %v1857_v16, %v1789_v51 }
 0xa3f   :  { %v1867_v52 = vadd.f32 %v1863_v15, %v2638_v35 }
 0xa40   :  { %v1866_v4 = vadd.f32 %v1858_v17, %v2640_v36 }
 0xa41   :  { %1869 = vst.msk [vmem:[#allocation2 + $0x8] sm:$0xff] %vm35_vm0, %v1867_v52 }
 0xa42   :  { %1868 = vst.msk [vmem:[#allocation2] sm:$0xff] %vm35_vm0, %v1866_v4 }
 0xa43   :  { %2309 = shalt.err (!%p2306_p12)
}
 0xa44   :  { %s2310_s24 = scalar_lea.hbm %s2754_s4, 256 }
 0xa45   :  { %p2311_p13 = scmp.ne.s32.totalorder %s2754_s4, %s2310_s24  ;;  %p2314_p0 = scmp.lt.u32.totalorder %s2310_s24, %s2754_s4 }
 0xa47   :  { %p2316_p1 = pnand %p2314_p0, %p2311_p13 }
 0xa49   :  { %2319 = shalt.err (!%p2316_p1)
}
 0xa4a   :  { %1881 = dma.vmem_to_hbm [thread:$0]  %s1876_s21, 256, %s2754_s4, [#allocation3], %s2336_s17, %s2336_s17, %s2332_s14  }
 0xa4b   :  { %2320 = dma.done.wait [#allocation3], 256  }
 0xa4c   :  { %2321 = vsyncadd [#allocation3], 4294967040 }
 0xa4d   :  { %2322 = dma.done.wait [#allocation5], 1024  }
 0xa4e   :  { %2323 = vsyncadd [#allocation5], 4294966272 }
 0xa4f   :  { %1900 = vsyncpa [#allocation3], 1 }
 0xa50   :  { %1901 = vsyncpa [#allocation5], 1 }

</bundles_post_ra>
